<compile_context>
chip_gen: v7x
topology: tpu7x:2x2x1
jax: 0.10.0
libtpu: 0.0.40
codegen_flags: <defaults>
</compile_context>

<pallas_src>
import functools

import jax
import jax.numpy as jnp
from jax.experimental import pallas as pl
from jax.experimental.pallas import tpu as pltpu

EPS = 1e-5
F32 = jnp.float32
BF16 = jnp.bfloat16
I8 = jnp.int8


def _round_up(x, m):
    return ((x + m - 1) // m) * m


def _fit_tile(n128, cap):
    """Largest power-of-two multiple of 128 that is <= cap and does not exceed n128."""
    t = 128
    while t * 2 <= cap and t * 2 <= n128:
        t *= 2
    return t


def _elu(x):
    return jnp.where(x > 0, x, jnp.exp(x) - 1.0)


def _ln_pad(x, gamma, beta, d_real):
    """LayerNorm over the last dim where only the first `d_real` lanes are meaningful.

    Padded lanes of `x` are exactly 0 and gamma/beta are zero-padded, so the moment form
    (sums over all lanes, divided by d_real) gives correct statistics and padded output
    lanes stay exactly 0.  Variance is clamped >= 0 against catastrophic cancellation.
    """
    inv = 1.0 / float(d_real)
    mu = jnp.sum(x, axis=-1, keepdims=True) * inv
    ex2 = jnp.sum(x * x, axis=-1, keepdims=True) * inv
    var = jnp.maximum(ex2 - mu * mu, 0.0)
    return (x - mu) * jax.lax.rsqrt(var + EPS) * gamma + beta


# --------------------------------------------------------------------------- kernels


def _ln1_kernel(h_ref, g_ref, b_ref, hl_ref, *, d_in, n_real, tile_rows):
    """Input LayerNorm, row-tiled, bf16 output (only ever a matmul operand downstream)."""
    x = h_ref[...]                                           # (T, DP_in) f32, padded lanes 0
    y = _ln_pad(x, g_ref[...], b_ref[...], d_in)
    # Explicitly zero padded rows (LN of an all-zero row would otherwise emit beta).
    row0 = pl.program_id(0) * tile_rows
    rows = jax.lax.broadcasted_iota(jnp.int32, y.shape, 0) + row0
    y = jnp.where(rows < n_real, y, 0.0)
    hl_ref[...] = y.astype(hl_ref.dtype)


def _conv_block_kernel(
    hl_m_ref,    # (TM, DP_in)   bf16: LN'd features of this row tile (resident across k)
    hl_k_ref,    # (TN, DP_in)   bf16: LN'd features of this aggregation chunk (streamed)
    adj_ref,     # (TM, TN)      int8: 0/1 adjacency tile (streamed, 1 byte/elem of HBM)
    invdeg_ref,  # (TM, 1)       f32 : 1/in-degree (0 for isolated nodes)
    wself_ref,   # (DP_in, DP_out)  bf16
    wneigh_ref,  # (DP_in, DP_out)  bf16
    bconv_ref,   # (1, DP_out)   f32
    rep_ref,     # (DP_in, DP_out)  bf16: repeat_interleave expressed as a 0/1 matrix
    g2_ref, bt2_ref,   # (1, DP_out) f32
    w1_ref,      # (DP_out, DP_hid) bf16
    b1_ref,      # (1, DP_hid)   f32
    w2_ref,      # (DP_hid, DP_out) bf16
    b2_ref,      # (1, DP_out)   f32
    out_ref,     # (TM, DP_out)  f32
    acc_ref,     # scratch (TM, DP_in) f32: neighbor-sum accumulator
    *, d_out,
):
    k = pl.program_id(1)

    @pl.when(k == 0)
    def _init():
        acc_ref[...] = jnp.zeros_like(acc_ref)

    # Sum-aggregation over this K chunk: upcast the 0/1 int8 tile on the VPU (hidden
    # under the adjacency DMA), one bf16 MXU matmul with f32 accumulation.
    adj_bf = adj_ref[...].astype(BF16)
    acc_ref[...] += jnp.dot(adj_bf, hl_k_ref[...], preferred_element_type=F32)

    @pl.when(k == pl.num_programs(1) - 1)
    def _epilogue():
        hl_tile = hl_m_ref[...]                          # (TM, DP_in) bf16
        h_neigh = acc_ref[...] * invdeg_ref[...]         # exact f32 mean aggregation

        # SAGEConv: self + neighbor linear maps, accumulated in f32 (no concat scratch).
        h_conv = jnp.dot(hl_tile, wself_ref[...], preferred_element_type=F32)
        h_conv = h_conv + jnp.dot(h_neigh.astype(BF16), wneigh_ref[...],
                                  preferred_element_type=F32)
        h_conv = _elu(h_conv + bconv_ref[...])           # dropout(p=0) == identity

        # Skip connection: repeat_interleave(hl, D_out/D_in) as an exact 0/1 matmul.
        h_conv = h_conv + jnp.dot(hl_tile, rep_ref[...], preferred_element_type=F32)

        # Interaction LayerNorm over the real D_out lanes.
        hn = _ln_pad(h_conv, g2_ref[...], bt2_ref[...], d_out)

        # Self-interaction MLP (bf16 MXU operands, f32 accumulation / elementwise).
        z = _elu(jnp.dot(hn.astype(BF16), w1_ref[...], preferred_element_type=F32)
                 + b1_ref[...])
        z = _elu(jnp.dot(z.astype(BF16), w2_ref[...], preferred_element_type=F32)
                 + b2_ref[...])

        # Final residual; DP_out is a multiple of 128 -> unmasked lane-dense stores.
        out_ref[...] = (z + hn).astype(out_ref.dtype)


# --------------------------------------------------------------------------- wrapper


def _vmem_capacity_bytes(default=64 << 20):
    try:
        info = pltpu.get_tpu_info()
        return int(getattr(info, "vmem_capacity_bytes", default))
    except Exception:
        return default


def residual_conv_block(h, adj, params):
    n, d_in = h.shape
    d_out = params["w_self"].shape[1]
    d_hid = params["w1"].shape[1]
    assert d_out % d_in == 0, "skip connection requires D_out to be a multiple of D_in"
    r = d_out // d_in

    # Lane-dense padded feature dims (multiples of 128).
    dp_in = _round_up(d_in, 128)
    dp_out = _round_up(d_out, 128)
    dp_hid = _round_up(d_hid, 128)

    # --- generation-aware tiling caps / VMEM budget.
    vmem_cap = _vmem_capacity_bytes()
    if vmem_cap >= (96 << 20):          # v5e / v6e: 128 MiB VMEM
        tm_cap, tn_cap = 512, 4096
        budget, vmem_limit = 80 << 20, 100 << 20
    else:                               # v7x: 64 MiB per TensorCore
        tm_cap, tn_cap = 256, 2048
        budget, vmem_limit = 32 << 20, 48 << 20

    n128 = _round_up(n, 128)
    tm = _fit_tile(n128, tm_cap)        # output row tile
    tn = _fit_tile(n128, tn_cap)        # aggregation K (column) tile

    w_bytes = (2 * (3 * dp_in * dp_out + 2 * dp_out * dp_hid)   # bf16 weights
               + 4 * (4 * dp_out + dp_hid))                     # f32 biases / LN params

    def working_set(tm_, tn_):
        return (2 * tm_ * tn_                 # adjacency tiles (int8, double-buffered)
                + 2 * tn_ * dp_in * 2         # hl aggregation tiles (bf16)
                + 2 * tm_ * dp_in * 2         # hl self tiles (bf16)
                + 2 * tm_ * 4                 # 1/deg tiles
                + 2 * tm_ * dp_out * 4        # output tiles (f32)
                + tm_ * dp_in * 4             # accumulator scratch
                + w_bytes)

    # Shrink the K tile first (keeps the MXU M-dimension full), then the row tile.
    while tn > 128 and working_set(tm, tn) > budget:
        tn //= 2
    while tm > 128 and working_set(tm, tn) > budget:
        tm //= 2

    row_pad = _round_up(n, tm)          # adjacency rows / output rows
    col_pad = _round_up(n, tn)          # aggregation K dim (decoupled from TM)
    h_pad = max(row_pad, col_pad)       # hl rows; multiple of both tm and tn (pow2*128)
    grid = (row_pad // tm, col_pad // tn)

    # --- pad / preprocess operands in the wrapper (cheap one-off XLA ops).
    def pad2(x, rows, cols):
        return jnp.pad(x.astype(F32), ((0, rows - x.shape[0]), (0, cols - x.shape[1])))

    def pad_row(v, cols):
        return jnp.pad(v.astype(F32), (0, cols - v.shape[0])).reshape(1, cols)

    h_p = pad2(h, h_pad, dp_in)

    # 0/1 adjacency (1 byte / element) + exact f32 1/deg (mean aggregation post-scale).
    adj01 = adj > 0
    deg = jnp.sum(adj01.astype(F32), axis=-1, keepdims=True)
    inv_deg = jnp.where(deg > 0, 1.0 / jnp.maximum(deg, 1.0), 0.0)
    adj_p = jnp.pad(adj01.astype(I8), ((0, row_pad - n), (0, col_pad - n)))
    inv_deg_p = jnp.pad(inv_deg, ((0, row_pad - n), (0, 0)))

    w_self = pad2(params["w_self"], dp_in, dp_out).astype(BF16)
    w_neigh = pad2(params["w_neigh"], dp_in, dp_out).astype(BF16)
    b_conv = pad_row(params["b_self"], dp_out)

    # repeat_interleave(., r, dim=-1) as a 0/1 matrix (exact: one unit entry per column).
    rep = jnp.repeat(jnp.eye(d_in, dtype=F32), r, axis=1)
    rep_p = pad2(rep, dp_in, dp_out).astype(BF16)

    g1, bt1 = pad_row(params["ln1_g"], dp_in), pad_row(params["ln1_b"], dp_in)
    g2, bt2 = pad_row(params["ln2_g"], dp_out), pad_row(params["ln2_b"], dp_out)
    w1 = pad2(params["w1"], dp_out, dp_hid).astype(BF16)
    b1 = pad_row(params["b1"], dp_hid)
    w2 = pad2(params["w2"], dp_hid, dp_out).astype(BF16)
    b2 = pad_row(params["b2"], dp_out)

    # --- kernel 1: input LayerNorm. Own (larger) row tile, decoupled from the adjacency
    #     tiling; ln_tm is a power-of-two multiple of 128 <= max(tm, tn), so it divides h_pad.
    ln_tm = min(512, max(tm, tn))
    hl = pl.pallas_call(
        functools.partial(_ln1_kernel, d_in=d_in, n_real=n, tile_rows=ln_tm),
        out_shape=jax.ShapeDtypeStruct((h_pad, dp_in), BF16),
        grid=(h_pad // ln_tm,),
        in_specs=[
            pl.BlockSpec((ln_tm, dp_in), lambda i: (i, 0)),
            pl.BlockSpec((1, dp_in), lambda i: (0, 0)),
            pl.BlockSpec((1, dp_in), lambda i: (0, 0)),
        ],
        out_specs=pl.BlockSpec((ln_tm, dp_in), lambda i: (i, 0)),
        compiler_params=pltpu.CompilerParams(dimension_semantics=("parallel",)),
    )(h_p, g1, bt1)

    # --- kernel 2: K-tiled aggregation + SAGEConv + ELU + skip + LayerNorm + MLP + residual.
    resident = lambda shape: pl.BlockSpec(shape, lambda i, k: (0, 0))

    flops = int(2 * row_pad * col_pad * dp_in            # aggregation
                + 2 * row_pad * dp_in * dp_out * 3       # self + neighbor + repeat-skip
                + 4 * row_pad * dp_out * dp_hid)         # MLP
    transcendentals = int(row_pad * (2 * dp_out + dp_hid))
    bytes_accessed = int(row_pad * col_pad                       # int8 adjacency
                         + grid[0] * col_pad * dp_in * 2         # hl agg stream (per row tile)
                         + h_pad * dp_in * 2
                         + row_pad * (dp_out * 4 + 4)
                         + w_bytes)

    out_p = pl.pallas_call(
        functools.partial(_conv_block_kernel, d_out=d_out),
        out_shape=jax.ShapeDtypeStruct((row_pad, dp_out), F32),
        grid=grid,
        in_specs=[
            pl.BlockSpec((tm, dp_in), lambda i, k: (i, 0)),   # hl of this row tile (resident over k)
            pl.BlockSpec((tn, dp_in), lambda i, k: (k, 0)),   # hl of this K chunk (streamed)
            pl.BlockSpec((tm, tn), lambda i, k: (i, k)),      # 0/1 int8 adjacency tile (streamed)
            pl.BlockSpec((tm, 1), lambda i, k: (i, 0)),       # 1/deg
            resident((dp_in, dp_out)),                        # w_self
            resident((dp_in, dp_out)),                        # w_neigh
            resident((1, dp_out)),                            # conv bias
            resident((dp_in, dp_out)),                        # repeat matrix
            resident((1, dp_out)),                            # ln2 gamma
            resident((1, dp_out)),                            # ln2 beta
            resident((dp_out, dp_hid)),                       # w1
            resident((1, dp_hid)),                            # b1
            resident((dp_hid, dp_out)),                       # w2
            resident((1, dp_out)),                            # b2
        ],
        out_specs=pl.BlockSpec((tm, dp_out), lambda i, k: (i, 0)),
        scratch_shapes=[pltpu.VMEM((tm, dp_in), F32)],
        compiler_params=pltpu.CompilerParams(
            dimension_semantics=("parallel", "arbitrary"),
            vmem_limit_bytes=vmem_limit,
        ),
        cost_estimate=pl.CostEstimate(
            flops=flops, transcendentals=transcendentals, bytes_accessed=bytes_accessed),
    )(hl, hl, adj_p, inv_deg_p, w_self, w_neigh, b_conv, rep_p, g2, bt2, w1, b1, w2, b2)

    return out_p[:n, :d_out]


# --------------------------------------------------------------------------- references


def _ln_ref(x, g, b):
    mu = jnp.mean(x, axis=-1, keepdims=True)
    ex2 = jnp.mean(x * x, axis=-1, keepdims=True)
    var = jnp.maximum(ex2 - mu * mu, 0.0)
    return (x - mu) * jax.lax.rsqrt(var + EPS) * g + b


def residual_conv_block_ref(h, adj, params):
    """Pure-JAX reference matching the kernel's bf16 matmul operands (f32 accumulation)."""
    d_in = h.shape[1]
    d_out = params["w_self"].shape[1]
    r = d_out // d_in
    hl = _ln_ref(h.astype(F32), params["ln1_g"], params["ln1_b"]).astype(BF16)
    adj01 = adj > 0
    deg = jnp.sum(adj01.astype(F32), axis=-1, keepdims=True)
    inv_deg = jnp.where(deg > 0, 1.0 / jnp.maximum(deg, 1.0), 0.0)
    h_sum = jnp.dot(adj01.astype(BF16), hl, preferred_element_type=F32)
    h_neigh = (h_sum * inv_deg).astype(BF16)
    conv = jnp.dot(hl, params["w_self"].astype(BF16), preferred_element_type=F32)
    conv = conv + jnp.dot(h_neigh, params["w_neigh"].astype(BF16), preferred_element_type=F32)
    conv = _elu(conv + params["b_self"])
    hc = conv + jnp.repeat(hl.astype(F32), r, axis=-1)
    hn = _ln_ref(hc, params["ln2_g"], params["ln2_b"])
    z = _elu(jnp.dot(hn.astype(BF16), params["w1"].astype(BF16),
                     preferred_element_type=F32) + params["b1"])
    z = _elu(jnp.dot(z.astype(BF16), params["w2"].astype(BF16),
                     preferred_element_type=F32) + params["b2"])
    return z + hn


def residual_conv_block_ref_f32(h, adj, params):
    """Full-precision reference of the module semantics (loose sanity check)."""
    d_in = h.shape[1]
    d_out = params["w_self"].shape[1]
    r = d_out // d_in
    hl = _ln_ref(h, params["ln1_g"], params["ln1_b"])
    deg = jnp.sum(adj, axis=-1, keepdims=True)
    inv_deg = jnp.where(deg > 0, 1.0 / jnp.maximum(deg, 1.0), 0.0)
    h_neigh = (adj @ hl) * inv_deg
    conv = _elu(hl @ params["w_self"] + h_neigh @ params["w_neigh"] + params["b_self"])
    hc = conv + jnp.repeat(hl, r, axis=-1)
    hn = _ln_ref(hc, params["ln2_g"], params["ln2_b"])
    z = _elu(hn @ params["w1"] + params["b1"])
    z = _elu(z @ params["w2"] + params["b2"])
    return z + hn


# --------------------------------------------------------------------------- params / main


def make_params(key, d_in, d_out):
    ks = jax.random.split(key, 8)
    s_in = 1.0 / jnp.sqrt(d_in)
    s_out = 1.0 / jnp.sqrt(d_out)
    s_hid = 1.0 / jnp.sqrt(4 * d_out)
    return {
        "ln1_g": 1.0 + 0.1 * jax.random.normal(ks[0], (d_in,), F32),
        "ln1_b": 0.1 * jax.random.normal(ks[1], (d_in,), F32),
        "w_self": s_in * jax.random.normal(ks[2], (d_in, d_out), F32),
        "b_self": s_in * jax.random.normal(ks[3], (d_out,), F32),
        "w_neigh": s_in * jax.random.normal(ks[4], (d_in, d_out), F32),
        "ln2_g": 1.0 + 0.1 * jax.random.normal(ks[5], (d_out,), F32),
        "ln2_b": 0.1 * jax.random.normal(ks[6], (d_out,), F32),
        "w1": s_out * jax.random.normal(ks[7], (d_out, 4 * d_out), F32),
        "b1": jnp.zeros((4 * d_out,), F32),
        "w2": s_hid * jax.random.normal(jax.random.fold_in(key, 99), (4 * d_out, d_out), F32),
        "b2": jnp.zeros((d_out,), F32),
    }


if __name__ == "__main__":
    key = jax.random.PRNGKey(0)
    k_h, k_adj, k_p = jax.random.split(key, 3)

    N, D_IN, D_OUT = 16, 32, 64  # nodes, in_feats, out_feats (skip ratio = 2)

    h = jax.random.normal(k_h, (N, D_IN), F32)
    # deterministic random directed graph as dense adjacency (row i = in-neighbors of i)
    adj = (jax.random.uniform(k_adj, (N, N)) < 0.3).astype(F32)
    params = make_params(k_p, D_IN, D_OUT)

    out = jax.block_until_ready(residual_conv_block(h, adj, params))

    ref_bf16 = residual_conv_block_ref(h, adj, params)       # matches kernel precision
    ref_f32 = residual_conv_block_ref_f32(h, adj, params)    # full-precision semantics

    assert out.shape == (N, D_OUT) and out.dtype == F32
    assert jnp.allclose(out, ref_bf16, atol=1e-2, rtol=1e-2), "kernel != bf16-matched reference"
    assert jnp.allclose(out, ref_f32, atol=2.5e-1, rtol=1e-1), "kernel deviates from f32 semantics"

    print("KERNEL_OK")
</pallas_src>

<mosaic_0001>
module attributes {stable_mosaic.version = 11 : i64} {
  func.func @_ln1_kernel(%arg0: i32, %arg1: memref<128x128xf32, #tpu.memory_space<vmem>>, %arg2: memref<1x128xf32, #tpu.memory_space<vmem>>, %arg3: memref<1x128xf32, #tpu.memory_space<vmem>>, %arg4: memref<128x128xbf16, #tpu.memory_space<vmem>>) attributes {dimension_semantics = [#tpu.dimension_semantics<parallel>], iteration_bounds = array<i64: 1>, scalar_prefetch = 0 : i64, scratch_operands = 0 : i64, tpu.core_type = #tpu.core_type<tc>, window_params = [{transform_indices = @transform_0, window_bounds = array<i64: 128, 128>}, {pipeline_mode = #tpu.pipeline_mode<synchronous>, transform_indices = @transform_1, window_bounds = array<i64: 1, 128>}, {pipeline_mode = #tpu.pipeline_mode<synchronous>, transform_indices = @transform_2, window_bounds = array<i64: 1, 128>}, {transform_indices = @transform_3, window_bounds = array<i64: 128, 128>}]} {
    %c0 = arith.constant 0 : index
    %c0_0 = arith.constant 0 : index
    %0 = vector.load %arg1[%c0, %c0_0] : memref<128x128xf32, #tpu.memory_space<vmem>>, vector<128x128xf32>
    %c0_1 = arith.constant 0 : index
    %c0_2 = arith.constant 0 : index
    %1 = vector.load %arg2[%c0_1, %c0_2] : memref<1x128xf32, #tpu.memory_space<vmem>>, vector<1x128xf32>
    %c0_3 = arith.constant 0 : index
    %c0_4 = arith.constant 0 : index
    %2 = vector.load %arg3[%c0_3, %c0_4] : memref<1x128xf32, #tpu.memory_space<vmem>>, vector<1x128xf32>
    %cst = arith.constant dense<0.000000e+00> : vector<128xf32>
    %3 = vector.multi_reduction <add>, %0, %cst [1] : vector<128x128xf32> to vector<128xf32>
    %4 = vector.shape_cast %3 : vector<128xf32> to vector<128x1xf32>
    %cst_5 = arith.constant 3.125000e-02 : f32
    %5 = vector.broadcast %cst_5 : f32 to vector<128x1xf32>
    %6 = arith.mulf %4, %5 : vector<128x1xf32>
    %7 = arith.mulf %0, %0 : vector<128x128xf32>
    %cst_6 = arith.constant dense<0.000000e+00> : vector<128xf32>
    %8 = vector.multi_reduction <add>, %7, %cst_6 [1] : vector<128x128xf32> to vector<128xf32>
    %9 = vector.shape_cast %8 : vector<128xf32> to vector<128x1xf32>
    %cst_7 = arith.constant 3.125000e-02 : f32
    %10 = vector.broadcast %cst_7 : f32 to vector<128x1xf32>
    %11 = arith.mulf %9, %10 : vector<128x1xf32>
    %12 = arith.mulf %6, %6 : vector<128x1xf32>
    %13 = arith.subf %11, %12 : vector<128x1xf32>
    %cst_8 = arith.constant 0.000000e+00 : f32
    %14 = vector.broadcast %cst_8 : f32 to vector<128x1xf32>
    %15 = arith.maximumf %13, %14 : vector<128x1xf32>
    %16 = vector.broadcast %6 : vector<128x1xf32> to vector<128x128xf32>
    %17 = arith.subf %0, %16 : vector<128x128xf32>
    %cst_9 = arith.constant 9.99999974E-6 : f32
    %18 = vector.broadcast %cst_9 : f32 to vector<128x1xf32>
    %19 = arith.addf %15, %18 : vector<128x1xf32>
    %20 = math.rsqrt %19 : vector<128x1xf32>
    %21 = vector.broadcast %20 : vector<128x1xf32> to vector<128x128xf32>
    %22 = arith.mulf %17, %21 : vector<128x128xf32>
    %23 = vector.broadcast %1 : vector<1x128xf32> to vector<128x128xf32>
    %24 = arith.mulf %22, %23 : vector<128x128xf32>
    %25 = vector.broadcast %2 : vector<1x128xf32> to vector<128x128xf32>
    %26 = arith.addf %24, %25 : vector<128x128xf32>
    %c128_i32 = arith.constant 128 : i32
    %27 = arith.muli %arg0, %c128_i32 : i32
    %28 = tpu.iota {dimensions = array<i32: 0>} : vector<128x128xi32>
    %29 = vector.broadcast %27 : i32 to vector<128x128xi32>
    %30 = arith.addi %28, %29 : vector<128x128xi32>
    %c16_i32 = arith.constant 16 : i32
    %31 = vector.broadcast %c16_i32 : i32 to vector<128x128xi32>
    %32 = arith.cmpi slt, %30, %31 : vector<128x128xi32>
    %cst_10 = arith.constant 0.000000e+00 : f32
    %33 = vector.broadcast %cst_10 : f32 to vector<128x128xf32>
    %34 = arith.select %32, %26, %33 : vector<128x128xi1>, vector<128x128xf32>
    %35 = arith.truncf %34 : vector<128x128xf32> to vector<128x128xbf16>
    %c0_11 = arith.constant 0 : index
    %c0_12 = arith.constant 0 : index
    %36 = vector.load %arg4[%c0_11, %c0_12] : memref<128x128xbf16, #tpu.memory_space<vmem>>, vector<128x128xbf16>
    tpu.vector_store %arg4[%c0_11, %c0_12], %35 {strides = array<i32>} : memref<128x128xbf16, #tpu.memory_space<vmem>>, vector<128x128xbf16>,
    return
  }
  func.func @transform_0(%arg0: i32) -> (i32, i32) {
    %c0_i32 = arith.constant 0 : i32
    %c0_i32_0 = arith.constant 0 : i32
    return %arg0, %c0_i32 : i32, i32
  }
  func.func @transform_1(%arg0: i32) -> (i32, i32) {
    %c0_i32 = arith.constant 0 : i32
    %c0_i32_0 = arith.constant 0 : i32
    %c0_i32_1 = arith.constant 0 : i32
    return %c0_i32, %c0_i32_0 : i32, i32
  }
  func.func @transform_2(%arg0: i32) -> (i32, i32) {
    %c0_i32 = arith.constant 0 : i32
    %c0_i32_0 = arith.constant 0 : i32
    %c0_i32_1 = arith.constant 0 : i32
    return %c0_i32, %c0_i32_0 : i32, i32
  }
  func.func @transform_3(%arg0: i32) -> (i32, i32) {
    %c0_i32 = arith.constant 0 : i32
    %c0_i32_0 = arith.constant 0 : i32
    return %arg0, %c0_i32 : i32, i32
  }
}

</mosaic_0001>

<bundles_post_ra>
// kernel: tpu_custom_call.1
= control target key start
LH: loop header
LB: loop body
LE: loop exit
PB: predicated region body
PF: predicated region fallthrough
CT: control target
= control target key end

     0   :  { %8 = vsyncpa [#allocation3], 0  ;;  %s620_s0 = inlined_call_operand.hbm [shape: f32[128,128], index: 0, kind: input, shape index: {}]   ;;  %s621_s1 = inlined_call_operand.vmem [shape: f32[1,128], index: 1, kind: input, shape index: {}]   ;;  %s622_s2 = inlined_call_operand.vmem [shape: f32[1,128], index: 2, kind: input, shape index: {}]   ;;  %s623_s3 = inlined_call_operand.hbm [shape: bf16[128,128], index: 3, kind: output, shape index: {}]  }
   0x1   :  { %9 = vsyncpa [#allocation4], 0  ;;  %s563_s12 = smov [#allocation2]   ;;  %s515_s16 = scalar_lea.hbm %s620_s0, 2048 }
   0x2   :  { %s15_s13 = sshll.u32 %s563_s12, 4  ;;  %p516_p0 = scmp.ne.s32.totalorder %s620_s0, %s515_s16  ;;  %s16_s13 = int_to_ptr.vmem [resolvable:$true] %s15_s13 }
   0x3   :  { %p519_p1 = scmp.lt.u32.totalorder %s515_s16, %s620_s0 }
   0x5   :  { %p521_p2 = pnand %p519_p1, %p516_p0 }
   0x7   :  { %524 = shalt.err (!%p521_p2)
}
   0x8   :  { %s525_s21 = scalar_lea.vmem %s16_s13, 2048  ;;  %p530_p4 = scmp.lt.s32.totalorder %s16_s13, %s16_s13 }
   0x9   :  { %p526_p3 = scmp.ne.s32.totalorder %s16_s13, %s525_s21  ;;  %p531_p5 = scmp.lt.s32.totalorder %s525_s21, %s525_s21 }
   0xb   :  { %p532_p6 = por %p531_p5, %p530_p4 }
   0xd   :  { %p533_p7 = pnand %p532_p6, %p526_p3 }
   0xf   :  { %536 = shalt.err (!%p533_p7)
}
  0x10   :  { %s564_s22 = smov 128   ;;  %s565_s23 = smov 8  }
  0x11   :  { %21 = dma.hbm_to_vmem [thread:$0]  %s620_s0, 2048, %s16_s13, [#allocation3], %s564_s22, %s564_s22, %s565_s23  }
  0x12   :  { %559 = dma.done.wait [#allocation3], 2048  }
  0x13   :  { %560 = vsyncadd [#allocation3], 4294965248  ;;  %v29_v0 = vld [vmem:[#allocation2] sm:$0xff]  ;;  %v30_v1 = vld [vmem:[#allocation2 + $0x8] sm:$0xff]  ;;  %v566_v4 = vmov 0.0|0.0   ;;  %s567_s29 = smov [#allocation5]  }
  0x14   :  { %47 = vadd.xlane.f32.xlu0 %v29_v0  ;;  %v95_v2 = vmul.f32 %v29_v0, %v29_v0  ;;  %v96_v3 = vmul.f32 %v30_v1, %v30_v1  ;;  %v483_v5 = vcombine.low %v566_v4, %v566_v4  ;;  %v484_v6 = vcombine.high %v566_v4, %v566_v4  ;;  %v479_v26 = vld [vmem:[%s621_s1] ss:$0 sm:$0xff]  ;;  %s467_s30 = sshll.u32 %s567_s29, 4  ;;  %s468_s30 = int_to_ptr.vmem [resolvable:$true] %s467_s30 }
  0x15   :  { %v480_v31 = vld [vmem:[%s622_s2] ss:$0 sm:$0xff]  ;;  %s537_s4 = scalar_lea.vmem %s468_s30, 1024  ;;  %p542_p9 = scmp.lt.s32.totalorder %s468_s30, %s468_s30 }
  0x16   :  { %111 = vadd.xlane.f32.xlu1 %v95_v2  ;;  %448 = vst [vmem:[#allocation5 + $0x8] sm:$0xf] %v483_v5  ;;  %449 = vst [vmem:[#allocation5 + $0xc] sm:$0xf] %v484_v6  ;;  %p538_p8 = scmp.ne.s32.totalorder %s468_s30, %s537_s4  ;;  %p543_p10 = scmp.lt.s32.totalorder %s537_s4, %s537_s4 }
  0x17   :  { %450 = vst [vmem:[#allocation5 + $0x10] sm:$0xf] %v483_v5  ;;  %451 = vst [vmem:[#allocation5 + $0x14] sm:$0xf] %v484_v6 }
  0x18   :  { %49 = vadd.xlane.f32.xlu0 %v30_v1  ;;  %452 = vst [vmem:[#allocation5 + $0x18] sm:$0xf] %v483_v5  ;;  %453 = vst [vmem:[#allocation5 + $0x1c] sm:$0xf] %v484_v6  ;;  %p544_p11 = por %p543_p10, %p542_p9 }
  0x19   :  { %454 = vst [vmem:[#allocation5 + $0x20] sm:$0xf] %v483_v5  ;;  %455 = vst [vmem:[#allocation5 + $0x24] sm:$0xf] %v484_v6 }
  0x1a   :  { %113 = vadd.xlane.f32.xlu1 %v96_v3  ;;  %456 = vst [vmem:[#allocation5 + $0x28] sm:$0xf] %v483_v5  ;;  %457 = vst [vmem:[#allocation5 + $0x2c] sm:$0xf] %v484_v6  ;;  %p545_p12 = pnand %p544_p11, %p538_p8 }
  0x1b   :  { %458 = vst [vmem:[#allocation5 + $0x30] sm:$0xf] %v483_v5  ;;  %459 = vst [vmem:[#allocation5 + $0x34] sm:$0xf] %v484_v6 }
  0x1c   :  { %460 = vst [vmem:[#allocation5 + $0x38] sm:$0xf] %v483_v5  ;;  %461 = vst [vmem:[#allocation5 + $0x3c] sm:$0xf] %v484_v6 }
  0xa1   :  { %v48_v7 = vpop.xlane.xlu0 %47 }
  0xa2   :  { %v79_v8 = vmul.f32 0.03125, %v48_v7 }
  0xa3   :  { %v112_v9 = vpop.xlane.xlu1 %111 }
  0xa4   :  { %v159_v10 = vmul.f32 %v79_v8, %v79_v8  ;;  %v143_v11 = vmul.f32 0.03125, %v112_v9  ;;  %v207_v23 = vsub.f32 %v29_v0, %v79_v8 }
  0xa5   :  { %v50_v12 = vpop.xlane.xlu0 %49 }
  0xa6   :  { %v175_v13 = vsub.f32 %v143_v11, %v159_v10  ;;  %v80_v14 = vmul.f32 0.03125, %v50_v12 }
  0xa7   :  { %v114_v15 = vpop.xlane.xlu1 %113 }
  0xa8   :  { %v191_v16 = vmax.f32 %v175_v13, 0.0  ;;  %v160_v17 = vmul.f32 %v80_v14, %v80_v14  ;;  %v144_v18 = vmul.f32 0.03125, %v114_v15  ;;  %v208_v27 = vsub.f32 %v30_v1, %v80_v14 }
  0xaa   :  { %v223_v19 = vadd.f32 1e-05, %v191_v16  ;;  %v176_v20 = vsub.f32 %v144_v18, %v160_v17 }
  0xac   :  { %511 = vrsqrt.f32 %v223_v19  ;;  %v192_v21 = vmax.f32 %v176_v20, 0.0 }
  0xae   :  { %v224_v22 = vadd.f32 1e-05, %v192_v21 }
  0xb0   :  { %513 = vrsqrt.f32 %v224_v22 }
  0xb6   :  { %v512_v24 = vpop.eup %511 }
  0xb7   :  { %v255_v25 = vmul.f32 %v512_v24, %v207_v23 }
  0xb9   :  { %v277_v29 = vmul.f32 %v479_v26, %v255_v25 }
  0xba   :  { %v514_v28 = vpop.eup %513 }
  0xbb   :  { %v256_v30 = vmul.f32 %v514_v28, %v208_v27  ;;  %v299_v33 = vadd.f32 %v480_v31, %v277_v29 }
  0xbd   :  { %v278_v32 = vmul.f32 %v479_v26, %v256_v30 }
  0xbf   :  { %v300_v34 = vadd.f32 %v480_v31, %v278_v32 }
  0xc1   :  { %v502_v35 = vpack.c.bf16 %v300_v34, %v299_v33 }
  0xc3   :  { %503 = vst [vmem:[#allocation5] sm:$0xff] %v502_v35  }
  0xc4   :  { %548 = shalt.err (!%p545_p12)
}
  0xc5   :  { %s549_s6 = scalar_lea.hbm %s623_s3, 1024 }
  0xc6   :  { %p550_p13 = scmp.ne.s32.totalorder %s623_s3, %s549_s6  ;;  %p553_p0 = scmp.lt.u32.totalorder %s549_s6, %s623_s3 }
  0xc8   :  { %p555_p1 = pnand %p553_p0, %p550_p13 }
  0xca   :  { %558 = shalt.err (!%p555_p1)
}
  0xcb   :  { %s568_s10 = smov 64   ;;  %s569_s11 = smov 4  }
  0xcc   :  { %473 = dma.vmem_to_hbm [thread:$0]  %s468_s30, 1024, %s623_s3, [#allocation4], %s568_s10, %s568_s10, %s569_s11  }
  0xcd   :  { %561 = dma.done.wait [#allocation4], 1024  }
  0xce   :  { %562 = vsyncadd [#allocation4], 4294966272 }
  0xcf   :  { %477 = vsyncpa [#allocation3], 1 }
  0xd0   :  { %478 = vsyncpa [#allocation4], 1 }

</bundles_post_ra>
